<compile_context>
chip_gen: v7x
topology: tpu7x:2x2x1
jax: 0.10.0
libtpu: 0.0.40
codegen_flags: <defaults>
</compile_context>

<pallas_src>
import functools
import math

import numpy as np

import jax
import jax.numpy as jnp
from jax.experimental import pallas as pl
from jax.experimental.pallas import tpu as pltpu


# ----------------------------------------------------------------------------
# Kernel
# ----------------------------------------------------------------------------
def _upsample_kernel(x_ref, m_ref, o_ref):
    # x_ref: (R, W)        R flattened input rows (one per (n, c, h))
    # m_ref: (W, s*s*W)    resident 0/1 replication matrix (constant index map)
    # o_ref: (R, s*s*W)    each input row expands to s output rows x s cols,
    #                      laid out contiguously so no transposes are needed.
    y = jnp.dot(x_ref[...], m_ref[...], preferred_element_type=jnp.float32)
    o_ref[...] = y.astype(o_ref.dtype)   # exact: each output = 1.0 * one input


# ----------------------------------------------------------------------------
# Host-side helpers (all static / compile-time)
# ----------------------------------------------------------------------------
def _check_integer_scale(scale_factor) -> int:
    if isinstance(scale_factor, (tuple, list)):
        # TODO(synk): per-axis (tuple) scale factors are not implemented.
        raise NotImplementedError("tuple scale_factor is not supported")
    s = float(scale_factor)
    if s <= 0 or s != int(s):
        raise ValueError(
            f"only positive integer scale_factor is supported, got {scale_factor!r}")
    return int(s)


def _replication_matrix(w: int, s: int) -> np.ndarray:
    """0/1 matrix M (W, s*s*W): flattened nearest-neighbour row expansion.

    Output column j = r*Ws + w_out (r = repeated output row, w_out = output col)
    sources input column w_out // s (PyTorch 'nearest' with integer scale).
    """
    ws = w * s
    sw = s * ws
    m = np.zeros((w, sw), dtype=np.float32)
    j = np.arange(sw)
    src = (j % ws) // s
    m[src, j] = 1.0
    return m


def _vmem_budget_bytes() -> int:
    """Generation-aware VMEM budget (half of physical, capped at 64 MiB)."""
    cap = 128 * 1024 * 1024
    try:
        cap = int(pltpu.get_tpu_info().vmem_capacity_bytes)
    except Exception:
        pass
    return max(min(cap // 2, 64 * 1024 * 1024), 16 * 1024 * 1024)


def _divisors(n: int):
    out = set()
    for d in range(1, int(math.isqrt(n)) + 1):
        if n % d == 0:
            out.add(d)
            out.add(n // d)
    return sorted(out)


def _pick_num_rows(total_rows, bytes_per_row, resident_bytes, data_budget):
    """Rows per grid step: divisor of total_rows, multiple of 8 (sublane tiling),
    double-buffered footprint under budget, grid length >= 2 and even when possible."""
    cands = [d for d in _divisors(total_rows) if d % 8 == 0 or d == total_rows]
    fits = [d for d in cands if 2 * d * bytes_per_row + resident_bytes <= data_budget]
    if not fits:
        # TODO(synk): for extreme W the smallest legal block may still exceed the
        # budget; would need W padding / a higher vmem limit.
        fits = [min(cands)]

    def score(d):
        g = total_rows // d
        return (g >= 2, g % 2 == 0, d)   # >=2 steps, even step count, biggest block

    return max(fits, key=score)


# ----------------------------------------------------------------------------
# Wrapper
# ----------------------------------------------------------------------------
@functools.partial(jax.jit, static_argnames=("scale_factor",))
def upsample_nearest(x: jax.Array, scale_factor=1) -> jax.Array:
    """Pallas equivalent of F.interpolate(x, scale_factor, mode='nearest') on NCHW."""
    s = _check_integer_scale(scale_factor)
    if not jnp.issubdtype(x.dtype, jnp.floating):
        # TODO(synk): integer dtypes (not used by csa_drf_fpn) are not supported.
        raise NotImplementedError("only floating-point inputs are supported")

    N, C, H, W = x.shape
    Hs, Ws = H * s, W * s
    SW = s * s * W                      # flattened output row length
    total_rows = N * C * H

    # Replication matrix in the compute dtype (0/1 entries -> exact in bf16/f32).
    if x.dtype in (jnp.dtype(jnp.bfloat16), jnp.dtype(jnp.float32)):
        r_dtype = x.dtype
    else:
        r_dtype = jnp.dtype(jnp.float32)
    r_itemsize = jnp.dtype(r_dtype).itemsize
    m_bytes = W * SW * r_itemsize

    budget = _vmem_budget_bytes()
    data_budget = budget - (4 << 20)    # headroom for compiler scratch
    bytes_per_row = (W + SW) * x.dtype.itemsize
    R = _pick_num_rows(total_rows, bytes_per_row, 2 * m_bytes, data_budget)
    grid = (total_rows // R,)

    # Free contiguous reshapes (no HBM transpose traffic).
    x2 = x.reshape(total_rows, W)
    m = jnp.asarray(_replication_matrix(W, s), dtype=r_dtype)

    flops = 2 * total_rows * W * SW
    bytes_accessed = (total_rows * W + total_rows * SW) * x.dtype.itemsize + m_bytes

    out2 = pl.pallas_call(
        _upsample_kernel,
        out_shape=jax.ShapeDtypeStruct((total_rows, SW), x.dtype),
        grid=grid,
        in_specs=[
            pl.BlockSpec((R, W), lambda i: (i, 0)),
            pl.BlockSpec((W, SW), lambda i: (0, 0)),   # resident replication matrix
        ],
        out_specs=pl.BlockSpec((R, SW), lambda i: (i, 0)),
        compiler_params=pltpu.CompilerParams(
            dimension_semantics=("parallel",),
            vmem_limit_bytes=int(budget),
        ),
        cost_estimate=pl.CostEstimate(
            flops=int(flops), transcendentals=0, bytes_accessed=int(bytes_accessed)),
    )(x2, m)

    # Free contiguous reshape back to NCHW-upsampled.
    return out2.reshape(N, C, Hs, Ws)


class Upsample:
    """Mirror of the PyTorch Upsample module (nearest mode, integer scale only)."""

    def __init__(self, scale_factor=1, mode="nearest"):
        assert mode == "nearest", "only mode='nearest' is implemented"
        self.scale_factor = _check_integer_scale(scale_factor)
        self.mode = mode

    def __call__(self, x):
        return upsample_nearest(x, scale_factor=self.scale_factor)


# ----------------------------------------------------------------------------
# Demo / self-test
# ----------------------------------------------------------------------------
if __name__ == "__main__":
    k0, k1 = jax.random.split(jax.random.PRNGKey(0))

    def _ref(x, s):
        return jnp.repeat(jnp.repeat(x, s, axis=2), s, axis=3)

    # f32, FPN-style small shape.
    x = jax.random.normal(k0, (2, 4, 16, 16), dtype=jnp.float32)
    up = Upsample(scale_factor=2, mode="nearest")
    y = jax.block_until_ready(up(x))
    assert y.shape == (2, 4, 32, 32), y.shape
    assert y.dtype == x.dtype, y.dtype
    assert jnp.array_equal(y, _ref(x, 2)), "f32 mismatch vs reference"

    # bf16 path (bit-exact: every output element is 1.0 * one input element).
    xb = x.astype(jnp.bfloat16)
    yb = jax.block_until_ready(Upsample(scale_factor=2)(xb))
    assert yb.dtype == jnp.bfloat16
    assert jnp.array_equal(yb, _ref(xb, 2)), "bf16 mismatch vs reference"

    # Non-square, non-power-of-two shape with scale 3.
    x3 = jax.random.normal(k1, (2, 6, 8, 24), dtype=jnp.float32)
    y3 = jax.block_until_ready(Upsample(scale_factor=3)(x3))
    assert y3.shape == (2, 6, 24, 72), y3.shape
    assert jnp.array_equal(y3, _ref(x3, 3)), "scale-3 mismatch vs reference"

    print("KERNEL_OK")
</pallas_src>

<mosaic_0001>
module attributes {stable_mosaic.version = 11 : i64} {
  func.func @_upsample_kernel(%arg0: i32, %arg1: memref<64x16xf32, #tpu.memory_space<vmem>>, %arg2: memref<16x64xf32, #tpu.memory_space<vmem>>, %arg3: memref<64x64xf32, #tpu.memory_space<vmem>>) attributes {dimension_semantics = [#tpu.dimension_semantics<parallel>], iteration_bounds = array<i64: 2>, scalar_prefetch = 0 : i64, scratch_operands = 0 : i64, tpu.core_type = #tpu.core_type<tc>, window_params = [{transform_indices = @transform_0, window_bounds = array<i64: 64, 16>}, {pipeline_mode = #tpu.pipeline_mode<synchronous>, transform_indices = @transform_1, window_bounds = array<i64: 16, 64>}, {transform_indices = @transform_2, window_bounds = array<i64: 64, 64>}]} {
    %c0 = arith.constant 0 : index
    %c0_0 = arith.constant 0 : index
    %0 = vector.load %arg1[%c0, %c0_0] : memref<64x16xf32, #tpu.memory_space<vmem>>, vector<64x16xf32>
    %c0_1 = arith.constant 0 : index
    %c0_2 = arith.constant 0 : index
    %1 = vector.load %arg2[%c0_1, %c0_2] : memref<16x64xf32, #tpu.memory_space<vmem>>, vector<16x64xf32>
    %cst = arith.constant dense<0.000000e+00> : vector<64x64xf32>
    %2 = tpu.matmul %0, %1, %cst {dimension_numbers = #tpu.dot_dimension_numbers<[1], [0], [0], [1], [0, 0, 1, 1], [], []>} : vector<64x16xf32>, vector<16x64xf32>, vector<64x64xf32> -> vector<64x64xf32>
    %c0_3 = arith.constant 0 : index
    %c0_4 = arith.constant 0 : index
    %3 = vector.load %arg3[%c0_3, %c0_4] : memref<64x64xf32, #tpu.memory_space<vmem>>, vector<64x64xf32>
    tpu.vector_store %arg3[%c0_3, %c0_4], %2 {strides = array<i32>} : memref<64x64xf32, #tpu.memory_space<vmem>>, vector<64x64xf32>,
    return
  }
  func.func @transform_0(%arg0: i32) -> (i32, i32) {
    %c0_i32 = arith.constant 0 : i32
    %c0_i32_0 = arith.constant 0 : i32
    return %arg0, %c0_i32 : i32, i32
  }
  func.func @transform_1(%arg0: i32) -> (i32, i32) {
    %c0_i32 = arith.constant 0 : i32
    %c0_i32_0 = arith.constant 0 : i32
    %c0_i32_1 = arith.constant 0 : i32
    return %c0_i32, %c0_i32_0 : i32, i32
  }
  func.func @transform_2(%arg0: i32) -> (i32, i32) {
    %c0_i32 = arith.constant 0 : i32
    %c0_i32_0 = arith.constant 0 : i32
    return %arg0, %c0_i32 : i32, i32
  }
}

</mosaic_0001>

<bundles_post_ra>
// kernel: upsample_nearest.1
= control target key start
LH: loop header
LB: loop body
LE: loop exit
PB: predicated region body
PF: predicated region fallthrough
CT: control target
= control target key end

     0   :  { %7 = vsyncpa [#allocation3], 0  ;;  %s923_s0 = inlined_call_operand.hbm [shape: f32[128,16], index: 0, kind: input, shape index: {}]   ;;  %s924_s1 = inlined_call_operand.hbm [shape: f32[16,64], index: 1, kind: input, shape index: {}]   ;;  %s925_s2 = inlined_call_operand.hbm [shape: f32[128,64], index: 2, kind: output, shape index: {}]  }
   0x1   :  { %9 = vsyncpa [#allocation3 + $0x1], 0 }
   0x2   :  { %10 = vsyncpa [#allocation6], 0 }
   0x3   :  { %11 = vsyncpa [#allocation4], 0 }
   0x4   :  { %13 = vsyncpa [#allocation4 + $0x1], 0  ;;  %s696_s9 = smov 0   ;;  %s698_s10 = smov 0  }
   0x5   :  { %s700_s11 = smov 0   ;;  %s702_s12 = smov 0  }
   0x6 LB: > { %s717_s13 = sadd.s32 4294967295, %s672_s12   ;;  %s425_s14 = sadd.s32 4294967294, %s672_s12   ;;  %s672_s12 = sphi %s702_s12, %s945_s12   ;;  %s668_s11 = sphi %s700_s11, %s944_s11   ;;  %s664_s10 = sphi %s698_s10, %s943_s10   ;;  %s660_s9 = sphi %s696_s9, %s942_s9  }
   0x7   : > { %p39_p0 = scmp.ne.s32.totalorder %s664_s10, %s660_s9  ;;  %p926_p1 = scmp.eq.s32.totalorder %s717_s13, 0 }
   0x8   : > { %p90_p3 = scmp.eq.s32.totalorder %s425_s14, 1  ;;  %p426_p5 = scmp.ge.s32.totalorder %s672_s12, 1 }
   0x9   : > { %p726_p4 = por %p926_p1, %p39_p0  ;;  %p97_p7 = scmp.lt.s32.totalorder %s672_s12, 3 }
   0xa   : > { %p731_p6 = por %p90_p3, %p39_p0  ;;  %s674_s18 = smov [#allocation5]  }
   0xb   : > { %s929_s15 = scalar_select %p726_p4, 1, 0 }
   0xc   : > { %s930_s16 = scalar_select %p731_p6, 1, 0 }
   0xd   : > { %p736_p8 = pnand %p426_p5, %p97_p7  ;;  %s109_s19 = sshll.u32 %s674_s18, 4  ;;  %s740_s19 = int_to_ptr.vmem [resolvable:$true] %s109_s19 }
   0xe   : > { %s752_s21 = sadd.s32 1, %s672_s12   ;;  %s26_s22 = sadd.s32 1, %s668_s11 }
   0xf   : > { %s931_s17 = scalar_select %p736_p8, 1, 0 }
  0x10   : > { %p491_p9 = pneg %p736_p8  ;;  %s23_s23 = ssub.s32 %s672_s12, %s752_s21 }
  0x11   : > { %s544_s26 = scalar_lea.hbm %s924_s1, 256 }
  0x12   : > { %p747_p11 = pnand %p491_p9, %p926_p1  ;;  %p545_p12 = scmp.ne.s32.totalorder %s924_s1, %s544_s26 }
  0x13   : > { %p551_p5 = scmp.lt.u32.totalorder %s544_s26, %s924_s1 }
  0x14   : > { %p546_p13 = pneg %p747_p11 }
  0x16   : > { %p547_p0 = pnand %p546_p13, %p545_p12 }
  0x18   : > { %p548_p3 = pneg %p547_p0 }
  0x1a   : > { %p553_p7 = pnand %p551_p5, %p548_p3 }
  0x1c   : > { %556 = shalt.err (!%p553_p7)
}
  0x1d   : > { %s557_s3 = scalar_lea.vmem %s740_s19, 256  ;;  %p565_p2 = scmp.lt.s32.totalorder %s740_s19, %s740_s19 }
  0x1e   : > { %p558_p9 = scmp.ne.s32.totalorder %s740_s19, %s557_s3  ;;  %p566_p6 = scmp.lt.s32.totalorder %s557_s3, %s557_s3 }
  0x20   : > { %p560_p10 = pnand %p558_p9, %p546_p13  ;;  %p567_p4 = por %p566_p6, %p565_p2 }
  0x22   : > { %p561_p1 = pneg %p560_p10 }
  0x24   : > { %p568_p8 = pnand %p567_p4, %p561_p1 }
  0x26   : > { %571 = shalt.err (!%p568_p8)
}
  0x27   : > { %s675_s4 = smov 128   ;;  %s676_s5 = smov 8  }
  0x28   : > { %494 = dma.hbm_to_vmem [thread:$0]  (!%p747_p11), %s924_s1, 256, %s740_s19, [#allocation6], %s675_s4, %s675_s4, %s676_s5  }
  0x29   : > { %p24_p1 = scmp.eq.s32.totalorder %s23_s23, 0  ;;  %p33_p2 = scmp.ne.s32.totalorder %s668_s11, %s664_s10 }
  0x2a   : > { %p34_p4 = scmp.eq.s32.totalorder %s672_s12, 0  ;;  %p504_p6 = scmp.lt.s32.totalorder %s672_s12, 2 }
  0x2b   : > { %s786_s8 = scalar_select %p24_p1, %s668_s11, %s26_s22  }
  0x2c   : > { %p35_p8 = por %p34_p4, %p33_p2  ;;  %p933_p10 = scmp.eq.s32.totalorder %s717_s13, 1 }
  0x2d   : > { %s123_s18 = sand.u32 1, %s668_s11   ;;  %s449_s20 = sshll.u32 %s672_s12, 10 }
  0x2e   : > { %p790_p12 = por %p933_p10, %p33_p2  ;;  %s429_s24 = sshll.u32 %s123_s18, 6 }
  0x2f   : > { %s799_s27 = scalar_lea.hbm %s923_s0, %s449_s20  ;;  %s127_s19 = scalar_lea.vmem [#allocation2], %s429_s24 }
  0x30   : > { %s134_s22 = sshll.u32 %s127_s19, 4  ;;  %p801_p11 = pnand %p504_p6, %p35_p8  ;;  %s805_s22 = int_to_ptr.vmem [resolvable:$true] %s134_s22 }
  0x31   : > { %s807_s28 = scalar_lea.sflag [#allocation3], %s123_s18  ;;  %s572_s29 = scalar_lea.hbm %s799_s27, 1024 }
  0x32   : > { %p573_p13 = scmp.ne.s32.totalorder %s799_s27, %s572_s29  ;;  %p574_p0 = pneg %p801_p11 }
  0x33   : > { %s577_s6 = scalar_lea.hbm %s923_s0, 2048  ;;  %p578_p7 = scmp.lt.u32.totalorder %s799_s27, %s923_s0 }
  0x34   : > { %p575_p3 = pnand %p574_p0, %p573_p13  ;;  %p579_p9 = scmp.lt.u32.totalorder %s577_s6, %s572_s29 }
  0x35   : > { %p581_p2 = scmp.lt.u32.totalorder %s572_s29, %s799_s27 }
  0x36   : > { %p576_p5 = pneg %p575_p3  ;;  %p580_p1 = por %p579_p9, %p578_p7 }
  0x38   : > { %p582_p4 = por %p581_p2, %p580_p1 }
  0x3a   : > { %p583_p6 = pnand %p582_p4, %p576_p5 }
  0x3c   : > { %586 = shalt.err (!%p583_p6)
}
  0x3d   : > { %s587_s18 = scalar_lea.vmem %s805_s22, 1024  ;;  %s677_s24 = smov [#allocation2]  }
  0x3e   : > { %p588_p8 = scmp.ne.s32.totalorder %s805_s22, %s587_s18  ;;  %s592_s25 = sshll.u32 %s677_s24, 4  ;;  %s593_s25 = int_to_ptr.vmem [resolvable:$false] %s592_s25 }
  0x3f   : > { %s594_s26 = scalar_lea.vmem %s593_s25, 2048  ;;  %p595_p3 = scmp.lt.s32.totalorder %s805_s22, %s593_s25 }
  0x40   : > { %p590_p10 = pnand %p588_p8, %p574_p0  ;;  %p596_p7 = scmp.lt.s32.totalorder %s594_s26, %s587_s18 }
  0x42   : > { %p591_p13 = pneg %p590_p10  ;;  %p597_p9 = por %p596_p7, %p595_p3 }
  0x44   : > { %p598_p1 = pnand %p597_p9, %p591_p13 }
  0x46   : > { %601 = shalt.err (!%p598_p1)
}
  0x47   : > { %498 = dma.hbm_to_vmem [thread:$0]  (!%p801_p11), %s799_s27, 1024, %s805_s22, %s807_s28, %s675_s4, %s675_s4, %s676_s5  }
  0x48   : > { %p936_p0 = scmp.ne.s32.totalorder %s931_s17, 0 }
  0x49   : > { %s841_s19 = sand.u32 (!%p936_p0), 1, %s664_s10   ;;  %p937_p5 = scmp.ne.s32.totalorder (!%p936_p0), %s929_s15, 0 }
  0x4a   : > { %146 = sbr.rel (%p936_p0) target bundleno = 325 (0x145), region = 28  ;;  %s433_s29 = sshll.u32 (!%p936_p0), %s841_s19, 6 }
  0x4b   : > { %s149_s30 = scalar_lea.sflag (!%p936_p0), [#allocation3], %s841_s19  ;;  %s152_s23 = scalar_lea.vmem (!%p936_p0), [#allocation2], %s433_s29 }
  0x51   : > { %647 = dma.done.wait (%p937_p5), %s149_s30, 1024  }
  0x52   : > { %649 = vsyncadd (%p937_p5), %s149_s30, 4294966272  ;;  %p938_p11 = scmp.eq.s32.totalorder %s717_s13, 0 }
  0x54   : > { %651 = dma.done.wait (%p938_p11), [#allocation6], 256   ;;  %p939_p2 = pmov %p938_p11 }
  0x55   : > { %vm189_vm0 = vcmask 130048   ;;  %v187_v0 = vld [vmem:[#allocation5] sm:$0xff]  ;;  %v188_v1 = vld [vmem:[#allocation5 + $0x8] sm:$0xff]  ;;  %v181_v7 = vld [vmem:[%s152_s23 + $0x10] sm:$0xff]  ;;  %vm319_vm1 = vcmask 523264   ;;  %s176_s15 = scalar_lea.vmem [#allocation7], %s433_s29 }
  0x56   : > { %653 = vsyncadd (%p939_p2), [#allocation6], 4294967040  ;;  %v179_v2 = vld [vmem:[%s152_s23] sm:$0xff]  ;;  %v477_v3 = vpack.c.bf16 %v188_v1, %v187_v0  ;;  %v180_v5 = vld [vmem:[%s152_s23 + $0x8] sm:$0xff]  ;;  %s342_s17 = sshll.u32 %s176_s15, 4  ;;  %s450_s4 = sshll.u32 %s717_s13, 10  ;;  %s868_s17 = int_to_ptr.vmem [resolvable:$true] %s342_s17 }
  0x57   : > { %465 = vmatprep.mubr.msk.f32.mxu0 %vm189_vm0, %v179_v2  ;;  %v183_v4 = vld [vmem:[%s152_s23 + $0x20] sm:$0xff]  ;;  %v184_v6 = vld [vmem:[%s152_s23 + $0x28] sm:$0xff]  ;;  %v185_v8 = vld [vmem:[%s152_s23 + $0x30] sm:$0xff]  ;;  %s875_s13 = scalar_lea.hbm %s925_s2, %s450_s4  ;;  %s329_s22 = scalar_lea.sflag [#allocation4], %s841_s19 }
  0x58   : > { %471 = vmatprep.mubr.msk.f32.mxu1 %vm189_vm0, %v183_v4  ;;  %478 = vmatprep.subr.bf16.mxu0 %v477_v3  ;;  %v182_v9 = vld [vmem:[%s152_s23 + $0x18] sm:$0xff]  ;;  %s602_s28 = scalar_lea.vmem %s868_s17, 1024  ;;  %s678_s3 = smov [#allocation7]  }
  0x59   : > { %481 = vmatprep.subr.bf16.mxu1 %v477_v3  ;;  %480 = vmatpush3.bf16.msra.mxu0 %v477_v3  ;;  %v186_v10 = vld [vmem:[%s152_s23 + $0x38] sm:$0xff]  ;;  %p603_p4 = scmp.ne.s32.totalorder %s868_s17, %s602_s28  ;;  %s606_s6 = sshll.u32 %s678_s3, 4  ;;  %s607_s6 = int_to_ptr.vmem [resolvable:$false] %s606_s6 }
  0x5a   : > { %482 = vmatpush3.bf16.msra.mxu1 %v477_v3  ;;  %s608_s7 = scalar_lea.vmem %s607_s6, 2048  ;;  %p609_p10 = scmp.lt.s32.totalorder %s868_s17, %s607_s6 }
  0x5b   : > { %p604_p6 = pnand %p603_p4, %p790_p12  ;;  %p610_p13 = scmp.lt.s32.totalorder %s608_s7, %s602_s28 }
  0x5c   : > { %466 = vmatmul.mubr.msk.f32.vlgmr.msra.gmra.mrb[0].mxu0 %vm189_vm0, %v180_v5 }
  0x5d   : > { %472 = vmatmul.mubr.msk.f32.vlgmr.msra.gmra.mrb[0].mxu1 %vm189_vm0, %v184_v6  ;;  %468 = vmatprep.mubr.msk.f32.mxu0 %vm189_vm0, %v181_v7  ;;  %p605_p8 = pneg %p604_p6  ;;  %p611_p3 = por %p610_p13, %p609_p10 }
  0x5e   : > { %474 = vmatprep.mubr.msk.f32.mxu1 %vm189_vm0, %v185_v8 }
  0x5f   : > { %p612_p7 = pnand %p611_p3, %p605_p8 }
  0x60   : > { %469 = vmatmul.mubr.msk.f32.gmra.mrb[2].mxu0 %vm189_vm0, %v182_v9 }
  0x61   : > { %475 = vmatmul.mubr.msk.f32.gmra.mrb[2].mxu1 %vm189_vm0, %v186_v10 }
 0x12f   : > { %v467_v11 = vpop.f32.mrb[0].mxu0 }
 0x130   : > { %v473_v12 = vpop.f32.mrb[0].mxu1  ;;  %321 = vst.msk [vmem:[%s176_s15 + $0x8] sm:$0xff] %vm319_vm1, %v467_v11  ;;  %v280_v13 = vpop.f32.mrb[1].mxu0 }
 0x131   : > { %325 = vst.msk [vmem:[%s176_s15 + $0x28] sm:$0xff] %vm319_vm1, %v473_v12  ;;  %v300_v14 = vpop.f32.mrb[1].mxu1  ;;  %320 = vst.msk [vmem:[%s176_s15] sm:$0xff] %vm319_vm1, %v280_v13 }
 0x132   : > { %324 = vst.msk [vmem:[%s176_s15 + $0x20] sm:$0xff] %vm319_vm1, %v300_v14 }
 0x133   : > { %v470_v15 = vpop.f32.mrb[2].mxu0 }
 0x134   : > { %v476_v16 = vpop.f32.mrb[2].mxu1  ;;  %323 = vst.msk [vmem:[%s176_s15 + $0x18] sm:$0xff] %vm319_vm1, %v470_v15  ;;  %v290_v17 = vpop.f32.mrb[3].mxu0 }
 0x135   : > { %327 = vst.msk [vmem:[%s176_s15 + $0x38] sm:$0xff] %vm319_vm1, %v476_v16  ;;  %v310_v18 = vpop.f32.mrb[3].mxu1  ;;  %322 = vst.msk [vmem:[%s176_s15 + $0x10] sm:$0xff] %vm319_vm1, %v290_v17 }
 0x136   : > { %326 = vst.msk [vmem:[%s176_s15 + $0x30] sm:$0xff] %vm319_vm1, %v310_v18 }
 0x137   : > { %615 = shalt.err (!%p612_p7)
}
 0x138   : > { %s616_s20 = scalar_lea.hbm %s875_s13, 1024  ;;  %s620_s25 = scalar_lea.hbm %s925_s2, 2048 }
 0x139   : > { %p617_p9 = scmp.ne.s32.totalorder %s875_s13, %s616_s20  ;;  %p621_p5 = scmp.lt.u32.totalorder %s875_s13, %s925_s2 }
 0x13a   : > { %p622_p11 = scmp.lt.u32.totalorder %s620_s25, %s616_s20  ;;  %p624_p4 = scmp.lt.u32.totalorder %s616_s20, %s875_s13 }
 0x13b   : > { %p618_p1 = pnand %p617_p9, %p790_p12 }
 0x13c   : > { %p623_p2 = por %p622_p11, %p621_p5 }
 0x13d   : > { %p619_p0 = pneg %p618_p1 }
 0x13e   : > { %p625_p6 = por %p624_p4, %p623_p2 }
 0x140   : > { %p626_p8 = pnand %p625_p6, %p619_p0 }
 0x142   : > { %629 = shalt.err (!%p626_p8)
}
 0x143   : > { %s679_s30 = smov 128   ;;  %s680_s23 = smov 8  }
 0x144   : > { %489 = dma.vmem_to_hbm [thread:$0]  (%p790_p12), %s868_s17, 1024, %s875_s13, %s329_s22, %s679_s30, %s679_s30, %s680_s23  }
 0x145 PF: > { %s357_s15 = sand.u32 1, %s660_s9   ;;  %p940_p10 = scmp.ne.s32.totalorder %s930_s16, 0 }
 0x146   : > { %p941_p13 = scmp.ge.s32.totalorder %s672_s12, 2  ;;  %s358_s4 = scalar_lea.sflag [#allocation4], %s357_s15 }
 0x148   : > { %p500_p3 = pnand %p941_p13, %p940_p10 }
 0x14a   : > { %655 = dma.done.wait (!%p500_p3), %s358_s4, 1024  }
 0x14b   : > { %657 = vsyncadd (!%p500_p3), %s358_s4, 4294966272  ;;  %p16_p7 = scmp.ge.s32.totalorder %s752_s21, 4   ;;  %s942_s9 = smov %s664_s10 }
 0x14c   : > { %s943_s10 = smov %s668_s11  ;;  %s944_s11 = smov %s786_s8 }
 0x14d   : > { %s945_s12 = smov %s752_s21  ;;  %18 = sbr.rel (!%p16_p7) target bundleno = 6 (0x6), region = 77 }
 0x154   :  { %363 = vsyncpa [#allocation3], 1 }
 0x155   :  { %365 = vsyncpa [#allocation3 + $0x1], 1 }
 0x156   :  { %366 = vsyncpa [#allocation6], 1 }
 0x157   :  { %367 = vsyncpa [#allocation4], 1 }
 0x158   :  { %369 = vsyncpa [#allocation4 + $0x1], 1 }

</bundles_post_ra>
